<compile_context>
chip_gen: v6e
topology: v6e:2x2x1
jax: 0.10.0
libtpu: 0.0.40
codegen_flags: <defaults>
</compile_context>

<pallas_src>
import math
import functools

import jax
import jax.numpy as jnp
from jax.experimental import pallas as pl
from jax.experimental.pallas import tpu as pltpu


def _mha_kernel(q_ref, k_ref, v_ref,
                wq_ref, bq_ref, wk_ref, bk_ref, wv_ref, bv_ref,
                wo_ref, bo_ref,
                o_ref,
                *, num_heads: int, head_size: int, seq_len: int):
    """One grid step processes `tb` batch elements (rows = tb * seq_len).

    Activations arrive pre-flattened to (rows, hidden). Weights arrive
    pre-transposed (nn.Linear (out, in) -> (in, out)) and fused across heads:
      wq/wk/wv: (hidden, all_head)    (wq/bq already scaled by 1/sqrt(d))
      bq/bk/bv: (1, all_head)         (f32)
      wo:       (all_head, all_head)
      bo:       (1, all_head)         (f32)
    """
    rows, _ = q_ref.shape
    tb = rows // seq_len
    d = head_size
    cdt = wq_ref.dtype            # MXU operand dtype (bf16 by default)

    xq = q_ref[...]
    xk = k_ref[...]
    xv = v_ref[...]

    # --- Fused projections: one full-width (N = all_head) dot per input. ---
    q_all = jnp.dot(xq, wq_ref[...], preferred_element_type=jnp.float32) + bq_ref[...]
    k_all = jnp.dot(xk, wk_ref[...], preferred_element_type=jnp.float32) + bk_ref[...]
    v_all = jnp.dot(xv, wv_ref[...], preferred_element_type=jnp.float32) + bv_ref[...]

    # --- Per-head attention core, batched over the tb batch elements. ---
    ctx_heads = []
    for h in range(num_heads):    # static unroll; heads are few
        lo = h * d
        q3 = q_all[:, lo:lo + d].astype(cdt).reshape(tb, seq_len, d)
        k3 = k_all[:, lo:lo + d].astype(cdt).reshape(tb, seq_len, d)
        v3 = v_all[:, lo:lo + d].astype(cdt).reshape(tb, seq_len, d)

        s = jnp.einsum('bqd,bkd->bqk', q3, k3,
                       preferred_element_type=jnp.float32)      # (tb, S, S) f32
        m = jnp.max(s, axis=-1, keepdims=True)
        e = jnp.exp(s - m)                                       # unnormalized probs
        denom = jnp.sum(e, axis=-1, keepdims=True)
        # TODO(synk): nn.Dropout(0.5) on attention probs is identity in eval
        # mode; training-time stochastic dropout is intentionally not applied.

        # Normalize AFTER the PV matmul: O(S*d) multiply instead of O(S^2).
        ctx = jnp.einsum('bqk,bkd->bqd', e.astype(cdt), v3,
                         preferred_element_type=jnp.float32)     # (tb, S, d) f32
        ctx = ctx * pl.reciprocal(denom, approx=True)            # EUP slot
        ctx_heads.append(ctx.reshape(rows, d))

    # Head-major concat matches the PyTorch permute+view layout exactly.
    ctx_all = jnp.concatenate(ctx_heads, axis=-1)                # (rows, all_head)

    # --- Output projection: one K = all_head dot. ---
    out = jnp.dot(ctx_all.astype(cdt), wo_ref[...],
                  preferred_element_type=jnp.float32) + bo_ref[...]
    o_ref[...] = out.astype(o_ref.dtype)


def multi_heads_attention(query, key, value, params, *,
                          num_heads: int, head_size: int,
                          compute_dtype=jnp.bfloat16,
                          batch_block=None):
    """query/key/value: (B, S, hidden).  Returns (B, S, all_head_size) f32."""
    B, S, hidden = query.shape
    all_head = num_heads * head_size
    wq, bq, wk, bk, wv, bv, wo, bo = params

    inv_sqrt_d = 1.0 / math.sqrt(head_size)

    # Weight prep (wrapper-side, weight-sized): transpose nn.Linear (out, in)
    # -> (in, out), cast MXU operands to compute_dtype, keep biases f32, and
    # fold the 1/sqrt(d) attention scale into the Q projection.
    wq2 = (wq.T * inv_sqrt_d).astype(compute_dtype)
    bq2 = (bq * inv_sqrt_d).reshape(1, all_head).astype(jnp.float32)
    wk2 = wk.T.astype(compute_dtype)
    bk2 = bk.reshape(1, all_head).astype(jnp.float32)
    wv2 = wv.T.astype(compute_dtype)
    bv2 = bv.reshape(1, all_head).astype(jnp.float32)
    wo2 = wo.T.astype(compute_dtype)
    bo2 = bo.reshape(1, all_head).astype(jnp.float32)

    # Grid: prefer >= 2 "parallel" steps over the batch (v7x has 2 TensorCores;
    # also lets BlockSpec double-buffering overlap activation DMA). Fall back
    # to a single step when the split would break sublane alignment.
    if batch_block is None:
        if B % 2 == 0 and ((B // 2) * S) % 8 == 0:
            tb = B // 2
        else:
            tb = B
    else:
        tb = batch_block
    assert B % tb == 0, "batch_block must divide batch"
    nb = B // tb
    rows = tb * S
    assert nb == 1 or rows % 8 == 0, "per-step row block must be sublane-aligned"

    # Flatten (B, S, H) -> (B*S, H): 2-D sublane-dense blocks.
    q2 = query.reshape(B * S, hidden).astype(compute_dtype)
    k2 = key.reshape(B * S, hidden).astype(compute_dtype)
    v2 = value.reshape(B * S, hidden).astype(compute_dtype)

    act_spec = pl.BlockSpec((rows, hidden), lambda i: (i, 0))
    out_spec = pl.BlockSpec((rows, all_head), lambda i: (i, 0))
    wqkv_spec = pl.BlockSpec((hidden, all_head), lambda i: (0, 0))
    bias_spec = pl.BlockSpec((1, all_head), lambda i: (0, 0))
    wo_spec = pl.BlockSpec((all_head, all_head), lambda i: (0, 0))

    itemsize = jnp.dtype(compute_dtype).itemsize
    flops = (2 * B * S * hidden * all_head * 3             # Q/K/V projections
             + 4 * B * num_heads * S * S * head_size       # QK^T and PV
             + 2 * B * S * all_head * all_head)            # output projection
    bytes_accessed = (3 * B * S * hidden * itemsize        # activations in
                      + B * S * all_head * 4               # output (f32)
                      + (3 * hidden + all_head) * all_head * itemsize  # weights
                      + 4 * all_head * 4)                  # biases (f32)
    cost = pl.CostEstimate(flops=flops,
                           transcendentals=B * num_heads * S * S,
                           bytes_accessed=bytes_accessed)

    kernel = functools.partial(_mha_kernel, num_heads=num_heads,
                               head_size=head_size, seq_len=S)

    out = pl.pallas_call(
        kernel,
        out_shape=jax.ShapeDtypeStruct((B * S, all_head), jnp.float32),
        grid=(nb,),
        in_specs=[act_spec, act_spec, act_spec,
                  wqkv_spec, bias_spec,
                  wqkv_spec, bias_spec,
                  wqkv_spec, bias_spec,
                  wo_spec, bias_spec],
        out_specs=out_spec,
        compiler_params=pltpu.CompilerParams(
            dimension_semantics=("parallel",),
            # 32 MiB is safe on all generations (v5e default scoped VMEM is
            # only 16 MiB); raise toward 64-100 MiB on v5e/v6e when tiles grow.
            vmem_limit_bytes=32 * 1024 * 1024),
        cost_estimate=cost,
    )(q2, k2, v2, wq2, bq2, wk2, bk2, wv2, bv2, wo2, bo2)

    return out.reshape(B, S, all_head)


def _init_params(key, hidden, num_heads, head_size):
    """Deterministic parameter init mirroring the PyTorch module's shapes."""
    all_head = num_heads * head_size
    ks = jax.random.split(key, 8)

    def xavier_normal(k, out_f, in_f):
        std = math.sqrt(2.0 / (in_f + out_f))
        return std * jax.random.normal(k, (out_f, in_f), dtype=jnp.float32)

    def linear_default(k, out_f, in_f):
        bound = 1.0 / math.sqrt(in_f)
        return jax.random.uniform(k, (out_f, in_f), minval=-bound, maxval=bound,
                                  dtype=jnp.float32)

    def bias_default(k, out_f, in_f):
        bound = 1.0 / math.sqrt(in_f)
        return jax.random.uniform(k, (out_f,), minval=-bound, maxval=bound,
                                  dtype=jnp.float32)

    wq = xavier_normal(ks[0], all_head, hidden)
    bq = bias_default(ks[1], all_head, hidden)
    wk = xavier_normal(ks[2], all_head, hidden)
    bk = bias_default(ks[3], all_head, hidden)
    wv = xavier_normal(ks[4], all_head, hidden)
    bv = bias_default(ks[5], all_head, hidden)
    wo = linear_default(ks[6], all_head, all_head)
    bo = bias_default(ks[7], all_head, all_head)
    return (wq, bq, wk, bk, wv, bv, wo, bo)


def _reference(query, key, value, params, num_heads, head_size):
    """Plain-JAX reference of the PyTorch forward (dropout in eval mode)."""
    wq, bq, wk, bk, wv, bv, wo, bo = params
    B, S, _ = query.shape
    all_head = num_heads * head_size

    def proj(x, w, b):
        return x @ w.T + b

    Q = proj(query, wq, bq).reshape(B, S, num_heads, head_size).transpose(0, 2, 1, 3)
    K = proj(key, wk, bk).reshape(B, S, num_heads, head_size).transpose(0, 2, 1, 3)
    V = proj(value, wv, bv).reshape(B, S, num_heads, head_size).transpose(0, 2, 1, 3)

    scores = jnp.einsum('bhqd,bhkd->bhqk', Q, K) / math.sqrt(head_size)
    probs = jax.nn.softmax(scores, axis=-1)
    ctx = jnp.einsum('bhqk,bhkd->bhqd', probs, V)
    ctx = ctx.transpose(0, 2, 1, 3).reshape(B, S, all_head)
    return ctx @ wo.T + bo


if __name__ == "__main__":
    # Module-consistent small shapes:
    #   hidden=32, num_labels (heads)=4, attention_head_size=8 -> all_head=32
    B, S, hidden = 2, 8, 32
    num_heads, head_size = 4, 8

    key = jax.random.PRNGKey(0)
    kq, kk, kv, kp = jax.random.split(key, 4)
    query = jax.random.normal(kq, (B, S, hidden), dtype=jnp.float32)
    key_in = jax.random.normal(kk, (B, S, hidden), dtype=jnp.float32)
    value = jax.random.normal(kv, (B, S, hidden), dtype=jnp.float32)

    params = _init_params(kp, hidden, num_heads, head_size)
    ref = _reference(query, key_in, value, params, num_heads, head_size)

    # Default path: bf16 MXU operands, f32 softmax stats / accumulation.
    out_bf16 = multi_heads_attention(query, key_in, value, params,
                                     num_heads=num_heads, head_size=head_size)
    out_bf16 = jax.block_until_ready(out_bf16)
    assert out_bf16.shape == (B, S, num_heads * head_size)
    assert jnp.allclose(out_bf16, ref, atol=5e-2, rtol=5e-2), "bf16 mismatch vs reference"

    # f32 MXU operands (tolerance slightly loosened only for the EUP approx
    # reciprocal in the softmax normalization).
    out_f32 = multi_heads_attention(query, key_in, value, params,
                                    num_heads=num_heads, head_size=head_size,
                                    compute_dtype=jnp.float32)
    out_f32 = jax.block_until_ready(out_f32)
    assert jnp.allclose(out_f32, ref, atol=5e-3, rtol=5e-3), "f32 mismatch vs reference"

    print("KERNEL_OK")
</pallas_src>

<mosaic_0001>
module attributes {stable_mosaic.version = 11 : i64} {
  func.func @_mha_kernel(%arg0: i32, %arg1: memref<8x32xbf16, #tpu.memory_space<vmem>>, %arg2: memref<8x32xbf16, #tpu.memory_space<vmem>>, %arg3: memref<8x32xbf16, #tpu.memory_space<vmem>>, %arg4: memref<32x32xbf16, #tpu.memory_space<vmem>>, %arg5: memref<1x32xf32, #tpu.memory_space<vmem>>, %arg6: memref<32x32xbf16, #tpu.memory_space<vmem>>, %arg7: memref<1x32xf32, #tpu.memory_space<vmem>>, %arg8: memref<32x32xbf16, #tpu.memory_space<vmem>>, %arg9: memref<1x32xf32, #tpu.memory_space<vmem>>, %arg10: memref<32x32xbf16, #tpu.memory_space<vmem>>, %arg11: memref<1x32xf32, #tpu.memory_space<vmem>>, %arg12: memref<8x32xf32, #tpu.memory_space<vmem>>) attributes {dimension_semantics = [#tpu.dimension_semantics<parallel>], iteration_bounds = array<i64: 2>, scalar_prefetch = 0 : i64, scratch_operands = 0 : i64, tpu.core_type = #tpu.core_type<tc>, window_params = [{transform_indices = @transform_0, window_bounds = array<i64: 8, 32>}, {transform_indices = @transform_1, window_bounds = array<i64: 8, 32>}, {transform_indices = @transform_2, window_bounds = array<i64: 8, 32>}, {pipeline_mode = #tpu.pipeline_mode<synchronous>, transform_indices = @transform_3, window_bounds = array<i64: 32, 32>}, {pipeline_mode = #tpu.pipeline_mode<synchronous>, transform_indices = @transform_4, window_bounds = array<i64: 1, 32>}, {pipeline_mode = #tpu.pipeline_mode<synchronous>, transform_indices = @transform_5, window_bounds = array<i64: 32, 32>}, {pipeline_mode = #tpu.pipeline_mode<synchronous>, transform_indices = @transform_6, window_bounds = array<i64: 1, 32>}, {pipeline_mode = #tpu.pipeline_mode<synchronous>, transform_indices = @transform_7, window_bounds = array<i64: 32, 32>}, {pipeline_mode = #tpu.pipeline_mode<synchronous>, transform_indices = @transform_8, window_bounds = array<i64: 1, 32>}, {pipeline_mode = #tpu.pipeline_mode<synchronous>, transform_indices = @transform_9, window_bounds = array<i64: 32, 32>}, {pipeline_mode = #tpu.pipeline_mode<synchronous>, transform_indices = @transform_10, window_bounds = array<i64: 1, 32>}, {transform_indices = @transform_11, window_bounds = array<i64: 8, 32>}]} {
    %c0 = arith.constant 0 : index
    %c0_0 = arith.constant 0 : index
    %0 = vector.load %arg1[%c0, %c0_0] : memref<8x32xbf16, #tpu.memory_space<vmem>>, vector<8x32xbf16>
    %c0_1 = arith.constant 0 : index
    %c0_2 = arith.constant 0 : index
    %1 = vector.load %arg2[%c0_1, %c0_2] : memref<8x32xbf16, #tpu.memory_space<vmem>>, vector<8x32xbf16>
    %c0_3 = arith.constant 0 : index
    %c0_4 = arith.constant 0 : index
    %2 = vector.load %arg3[%c0_3, %c0_4] : memref<8x32xbf16, #tpu.memory_space<vmem>>, vector<8x32xbf16>
    %c0_5 = arith.constant 0 : index
    %c0_6 = arith.constant 0 : index
    %3 = vector.load %arg4[%c0_5, %c0_6] : memref<32x32xbf16, #tpu.memory_space<vmem>>, vector<32x32xbf16>
    %cst = arith.constant dense<0.000000e+00> : vector<8x32xf32>
    %4 = tpu.matmul %0, %3, %cst {dimension_numbers = #tpu.dot_dimension_numbers<[1], [0], [0], [1], [0, 0, 1, 1], [], []>} : vector<8x32xbf16>, vector<32x32xbf16>, vector<8x32xf32> -> vector<8x32xf32>
    %c0_7 = arith.constant 0 : index
    %c0_8 = arith.constant 0 : index
    %5 = vector.load %arg5[%c0_7, %c0_8] : memref<1x32xf32, #tpu.memory_space<vmem>>, vector<1x32xf32>
    %6 = vector.broadcast %5 : vector<1x32xf32> to vector<8x32xf32>
    %7 = arith.addf %4, %6 : vector<8x32xf32>
    %c0_9 = arith.constant 0 : index
    %c0_10 = arith.constant 0 : index
    %8 = vector.load %arg6[%c0_9, %c0_10] : memref<32x32xbf16, #tpu.memory_space<vmem>>, vector<32x32xbf16>
    %cst_11 = arith.constant dense<0.000000e+00> : vector<8x32xf32>
    %9 = tpu.matmul %1, %8, %cst_11 {dimension_numbers = #tpu.dot_dimension_numbers<[1], [0], [0], [1], [0, 0, 1, 1], [], []>} : vector<8x32xbf16>, vector<32x32xbf16>, vector<8x32xf32> -> vector<8x32xf32>
    %c0_12 = arith.constant 0 : index
    %c0_13 = arith.constant 0 : index
    %10 = vector.load %arg7[%c0_12, %c0_13] : memref<1x32xf32, #tpu.memory_space<vmem>>, vector<1x32xf32>
    %11 = vector.broadcast %10 : vector<1x32xf32> to vector<8x32xf32>
    %12 = arith.addf %9, %11 : vector<8x32xf32>
    %c0_14 = arith.constant 0 : index
    %c0_15 = arith.constant 0 : index
    %13 = vector.load %arg8[%c0_14, %c0_15] : memref<32x32xbf16, #tpu.memory_space<vmem>>, vector<32x32xbf16>
    %cst_16 = arith.constant dense<0.000000e+00> : vector<8x32xf32>
    %14 = tpu.matmul %2, %13, %cst_16 {dimension_numbers = #tpu.dot_dimension_numbers<[1], [0], [0], [1], [0, 0, 1, 1], [], []>} : vector<8x32xbf16>, vector<32x32xbf16>, vector<8x32xf32> -> vector<8x32xf32>
    %c0_17 = arith.constant 0 : index
    %c0_18 = arith.constant 0 : index
    %15 = vector.load %arg9[%c0_17, %c0_18] : memref<1x32xf32, #tpu.memory_space<vmem>>, vector<1x32xf32>
    %16 = vector.broadcast %15 : vector<1x32xf32> to vector<8x32xf32>
    %17 = arith.addf %14, %16 : vector<8x32xf32>
    %18 = vector.extract_strided_slice %7 {offsets = [0, 0], sizes = [8, 8], strides = [1, 1]} : vector<8x32xf32> to vector<8x8xf32>
    %19 = arith.truncf %18 : vector<8x8xf32> to vector<8x8xbf16>
    %20 = vector.shape_cast %19 : vector<8x8xbf16> to vector<1x8x8xbf16>
    %21 = vector.extract_strided_slice %12 {offsets = [0, 0], sizes = [8, 8], strides = [1, 1]} : vector<8x32xf32> to vector<8x8xf32>
    %22 = arith.truncf %21 : vector<8x8xf32> to vector<8x8xbf16>
    %23 = vector.shape_cast %22 : vector<8x8xbf16> to vector<1x8x8xbf16>
    %24 = vector.extract_strided_slice %17 {offsets = [0, 0], sizes = [8, 8], strides = [1, 1]} : vector<8x32xf32> to vector<8x8xf32>
    %25 = arith.truncf %24 : vector<8x8xf32> to vector<8x8xbf16>
    %26 = vector.shape_cast %25 : vector<8x8xbf16> to vector<1x8x8xbf16>
    "tpu.trace_start"() <{level = 10 : i32, message = "bqd,bkd->bqk"}> : () -> ()
    %cst_19 = arith.constant dense<0.000000e+00> : vector<1x8x8xf32>
    %27 = tpu.matmul %20, %23, %cst_19 {dimension_numbers = #tpu.dot_dimension_numbers<[2], [2], [1], [1], [0, 0, 0, 1, 1, 1], [0], [0]>} : vector<1x8x8xbf16>, vector<1x8x8xbf16>, vector<1x8x8xf32> -> vector<1x8x8xf32>
    "tpu.trace_stop"() : () -> ()
    %cst_20 = arith.constant dense<0xFF800000> : vector<1x8xf32>
    %28 = vector.multi_reduction <maximumf>, %27, %cst_20 [2] : vector<1x8x8xf32> to vector<1x8xf32>
    %29 = vector.shape_cast %28 : vector<1x8xf32> to vector<1x8x1xf32>
    %30 = vector.broadcast %29 : vector<1x8x1xf32> to vector<1x8x8xf32>
    %31 = arith.subf %27, %30 : vector<1x8x8xf32>
    %32 = math.exp %31 : vector<1x8x8xf32>
    %cst_21 = arith.constant dense<0.000000e+00> : vector<1x8xf32>
    %33 = vector.multi_reduction <add>, %32, %cst_21 [2] : vector<1x8x8xf32> to vector<1x8xf32>
    %34 = vector.shape_cast %33 : vector<1x8xf32> to vector<1x8x1xf32>
    %35 = arith.truncf %32 : vector<1x8x8xf32> to vector<1x8x8xbf16>
    "tpu.trace_start"() <{level = 10 : i32, message = "bqk,bkd->bqd"}> : () -> ()
    %cst_22 = arith.constant dense<0.000000e+00> : vector<1x8x8xf32>
    %36 = tpu.matmul %35, %26, %cst_22 {dimension_numbers = #tpu.dot_dimension_numbers<[2], [1], [1], [2], [0, 0, 0, 1, 1, 2], [0], [0]>} : vector<1x8x8xbf16>, vector<1x8x8xbf16>, vector<1x8x8xf32> -> vector<1x8x8xf32>
    "tpu.trace_stop"() : () -> ()
    %37 = tpu.reciprocal %34 {approx = true} : vector<1x8x1xf32> -> vector<1x8x1xf32>
    %38 = vector.broadcast %37 : vector<1x8x1xf32> to vector<1x8x8xf32>
    %39 = arith.mulf %36, %38 : vector<1x8x8xf32>
    %40 = vector.shape_cast %39 : vector<1x8x8xf32> to vector<8x8xf32>
    %41 = vector.extract_strided_slice %7 {offsets = [0, 8], sizes = [8, 8], strides = [1, 1]} : vector<8x32xf32> to vector<8x8xf32>
    %42 = arith.truncf %41 : vector<8x8xf32> to vector<8x8xbf16>
    %43 = vector.shape_cast %42 : vector<8x8xbf16> to vector<1x8x8xbf16>
    %44 = vector.extract_strided_slice %12 {offsets = [0, 8], sizes = [8, 8], strides = [1, 1]} : vector<8x32xf32> to vector<8x8xf32>
    %45 = arith.truncf %44 : vector<8x8xf32> to vector<8x8xbf16>
    %46 = vector.shape_cast %45 : vector<8x8xbf16> to vector<1x8x8xbf16>
    %47 = vector.extract_strided_slice %17 {offsets = [0, 8], sizes = [8, 8], strides = [1, 1]} : vector<8x32xf32> to vector<8x8xf32>
    %48 = arith.truncf %47 : vector<8x8xf32> to vector<8x8xbf16>
    %49 = vector.shape_cast %48 : vector<8x8xbf16> to vector<1x8x8xbf16>
    "tpu.trace_start"() <{level = 10 : i32, message = "bqd,bkd->bqk"}> : () -> ()
    %cst_23 = arith.constant dense<0.000000e+00> : vector<1x8x8xf32>
    %50 = tpu.matmul %43, %46, %cst_23 {dimension_numbers = #tpu.dot_dimension_numbers<[2], [2], [1], [1], [0, 0, 0, 1, 1, 1], [0], [0]>} : vector<1x8x8xbf16>, vector<1x8x8xbf16>, vector<1x8x8xf32> -> vector<1x8x8xf32>
    "tpu.trace_stop"() : () -> ()
    %cst_24 = arith.constant dense<0xFF800000> : vector<1x8xf32>
    %51 = vector.multi_reduction <maximumf>, %50, %cst_24 [2] : vector<1x8x8xf32> to vector<1x8xf32>
    %52 = vector.shape_cast %51 : vector<1x8xf32> to vector<1x8x1xf32>
    %53 = vector.broadcast %52 : vector<1x8x1xf32> to vector<1x8x8xf32>
    %54 = arith.subf %50, %53 : vector<1x8x8xf32>
    %55 = math.exp %54 : vector<1x8x8xf32>
    %cst_25 = arith.constant dense<0.000000e+00> : vector<1x8xf32>
    %56 = vector.multi_reduction <add>, %55, %cst_25 [2] : vector<1x8x8xf32> to vector<1x8xf32>
    %57 = vector.shape_cast %56 : vector<1x8xf32> to vector<1x8x1xf32>
    %58 = arith.truncf %55 : vector<1x8x8xf32> to vector<1x8x8xbf16>
    "tpu.trace_start"() <{level = 10 : i32, message = "bqk,bkd->bqd"}> : () -> ()
    %cst_26 = arith.constant dense<0.000000e+00> : vector<1x8x8xf32>
    %59 = tpu.matmul %58, %49, %cst_26 {dimension_numbers = #tpu.dot_dimension_numbers<[2], [1], [1], [2], [0, 0, 0, 1, 1, 2], [0], [0]>} : vector<1x8x8xbf16>, vector<1x8x8xbf16>, vector<1x8x8xf32> -> vector<1x8x8xf32>
    "tpu.trace_stop"() : () -> ()
    %60 = tpu.reciprocal %57 {approx = true} : vector<1x8x1xf32> -> vector<1x8x1xf32>
    %61 = vector.broadcast %60 : vector<1x8x1xf32> to vector<1x8x8xf32>
    %62 = arith.mulf %59, %61 : vector<1x8x8xf32>
    %63 = vector.shape_cast %62 : vector<1x8x8xf32> to vector<8x8xf32>
    %64 = vector.extract_strided_slice %7 {offsets = [0, 16], sizes = [8, 8], strides = [1, 1]} : vector<8x32xf32> to vector<8x8xf32>
    %65 = arith.truncf %64 : vector<8x8xf32> to vector<8x8xbf16>
    %66 = vector.shape_cast %65 : vector<8x8xbf16> to vector<1x8x8xbf16>
    %67 = vector.extract_strided_slice %12 {offsets = [0, 16], sizes = [8, 8], strides = [1, 1]} : vector<8x32xf32> to vector<8x8xf32>
    %68 = arith.truncf %67 : vector<8x8xf32> to vector<8x8xbf16>
    %69 = vector.shape_cast %68 : vector<8x8xbf16> to vector<1x8x8xbf16>
    %70 = vector.extract_strided_slice %17 {offsets = [0, 16], sizes = [8, 8], strides = [1, 1]} : vector<8x32xf32> to vector<8x8xf32>
    %71 = arith.truncf %70 : vector<8x8xf32> to vector<8x8xbf16>
    %72 = vector.shape_cast %71 : vector<8x8xbf16> to vector<1x8x8xbf16>
    "tpu.trace_start"() <{level = 10 : i32, message = "bqd,bkd->bqk"}> : () -> ()
    %cst_27 = arith.constant dense<0.000000e+00> : vector<1x8x8xf32>
    %73 = tpu.matmul %66, %69, %cst_27 {dimension_numbers = #tpu.dot_dimension_numbers<[2], [2], [1], [1], [0, 0, 0, 1, 1, 1], [0], [0]>} : vector<1x8x8xbf16>, vector<1x8x8xbf16>, vector<1x8x8xf32> -> vector<1x8x8xf32>
    "tpu.trace_stop"() : () -> ()
    %cst_28 = arith.constant dense<0xFF800000> : vector<1x8xf32>
    %74 = vector.multi_reduction <maximumf>, %73, %cst_28 [2] : vector<1x8x8xf32> to vector<1x8xf32>
    %75 = vector.shape_cast %74 : vector<1x8xf32> to vector<1x8x1xf32>
    %76 = vector.broadcast %75 : vector<1x8x1xf32> to vector<1x8x8xf32>
    %77 = arith.subf %73, %76 : vector<1x8x8xf32>
    %78 = math.exp %77 : vector<1x8x8xf32>
    %cst_29 = arith.constant dense<0.000000e+00> : vector<1x8xf32>
    %79 = vector.multi_reduction <add>, %78, %cst_29 [2] : vector<1x8x8xf32> to vector<1x8xf32>
    %80 = vector.shape_cast %79 : vector<1x8xf32> to vector<1x8x1xf32>
    %81 = arith.truncf %78 : vector<1x8x8xf32> to vector<1x8x8xbf16>
    "tpu.trace_start"() <{level = 10 : i32, message = "bqk,bkd->bqd"}> : () -> ()
    %cst_30 = arith.constant dense<0.000000e+00> : vector<1x8x8xf32>
    %82 = tpu.matmul %81, %72, %cst_30 {dimension_numbers = #tpu.dot_dimension_numbers<[2], [1], [1], [2], [0, 0, 0, 1, 1, 2], [0], [0]>} : vector<1x8x8xbf16>, vector<1x8x8xbf16>, vector<1x8x8xf32> -> vector<1x8x8xf32>
    "tpu.trace_stop"() : () -> ()
    %83 = tpu.reciprocal %80 {approx = true} : vector<1x8x1xf32> -> vector<1x8x1xf32>
    %84 = vector.broadcast %83 : vector<1x8x1xf32> to vector<1x8x8xf32>
    %85 = arith.mulf %82, %84 : vector<1x8x8xf32>
    %86 = vector.shape_cast %85 : vector<1x8x8xf32> to vector<8x8xf32>
    %87 = vector.extract_strided_slice %7 {offsets = [0, 24], sizes = [8, 8], strides = [1, 1]} : vector<8x32xf32> to vector<8x8xf32>
    %88 = arith.truncf %87 : vector<8x8xf32> to vector<8x8xbf16>
    %89 = vector.shape_cast %88 : vector<8x8xbf16> to vector<1x8x8xbf16>
    %90 = vector.extract_strided_slice %12 {offsets = [0, 24], sizes = [8, 8], strides = [1, 1]} : vector<8x32xf32> to vector<8x8xf32>
    %91 = arith.truncf %90 : vector<8x8xf32> to vector<8x8xbf16>
    %92 = vector.shape_cast %91 : vector<8x8xbf16> to vector<1x8x8xbf16>
    %93 = vector.extract_strided_slice %17 {offsets = [0, 24], sizes = [8, 8], strides = [1, 1]} : vector<8x32xf32> to vector<8x8xf32>
    %94 = arith.truncf %93 : vector<8x8xf32> to vector<8x8xbf16>
    %95 = vector.shape_cast %94 : vector<8x8xbf16> to vector<1x8x8xbf16>
    "tpu.trace_start"() <{level = 10 : i32, message = "bqd,bkd->bqk"}> : () -> ()
    %cst_31 = arith.constant dense<0.000000e+00> : vector<1x8x8xf32>
    %96 = tpu.matmul %89, %92, %cst_31 {dimension_numbers = #tpu.dot_dimension_numbers<[2], [2], [1], [1], [0, 0, 0, 1, 1, 1], [0], [0]>} : vector<1x8x8xbf16>, vector<1x8x8xbf16>, vector<1x8x8xf32> -> vector<1x8x8xf32>
    "tpu.trace_stop"() : () -> ()
    %cst_32 = arith.constant dense<0xFF800000> : vector<1x8xf32>
    %97 = vector.multi_reduction <maximumf>, %96, %cst_32 [2] : vector<1x8x8xf32> to vector<1x8xf32>
    %98 = vector.shape_cast %97 : vector<1x8xf32> to vector<1x8x1xf32>
    %99 = vector.broadcast %98 : vector<1x8x1xf32> to vector<1x8x8xf32>
    %100 = arith.subf %96, %99 : vector<1x8x8xf32>
    %101 = math.exp %100 : vector<1x8x8xf32>
    %cst_33 = arith.constant dense<0.000000e+00> : vector<1x8xf32>
    %102 = vector.multi_reduction <add>, %101, %cst_33 [2] : vector<1x8x8xf32> to vector<1x8xf32>
    %103 = vector.shape_cast %102 : vector<1x8xf32> to vector<1x8x1xf32>
    %104 = arith.truncf %101 : vector<1x8x8xf32> to vector<1x8x8xbf16>
    "tpu.trace_start"() <{level = 10 : i32, message = "bqk,bkd->bqd"}> : () -> ()
    %cst_34 = arith.constant dense<0.000000e+00> : vector<1x8x8xf32>
    %105 = tpu.matmul %104, %95, %cst_34 {dimension_numbers = #tpu.dot_dimension_numbers<[2], [1], [1], [2], [0, 0, 0, 1, 1, 2], [0], [0]>} : vector<1x8x8xbf16>, vector<1x8x8xbf16>, vector<1x8x8xf32> -> vector<1x8x8xf32>
    "tpu.trace_stop"() : () -> ()
    %106 = tpu.reciprocal %103 {approx = true} : vector<1x8x1xf32> -> vector<1x8x1xf32>
    %107 = vector.broadcast %106 : vector<1x8x1xf32> to vector<1x8x8xf32>
    %108 = arith.mulf %105, %107 : vector<1x8x8xf32>
    %109 = vector.shape_cast %108 : vector<1x8x8xf32> to vector<8x8xf32>
    %110 = tpu.concatenate %40, %63, %86, %109 in 1 : vector<8x8xf32>, vector<8x8xf32>, vector<8x8xf32>, vector<8x8xf32> -> vector<8x32xf32>
    %111 = arith.truncf %110 : vector<8x32xf32> to vector<8x32xbf16>
    %c0_35 = arith.constant 0 : index
    %c0_36 = arith.constant 0 : index
    %112 = vector.load %arg10[%c0_35, %c0_36] : memref<32x32xbf16, #tpu.memory_space<vmem>>, vector<32x32xbf16>
    %cst_37 = arith.constant dense<0.000000e+00> : vector<8x32xf32>
    %113 = tpu.matmul %111, %112, %cst_37 {dimension_numbers = #tpu.dot_dimension_numbers<[1], [0], [0], [1], [0, 0, 1, 1], [], []>} : vector<8x32xbf16>, vector<32x32xbf16>, vector<8x32xf32> -> vector<8x32xf32>
    %c0_38 = arith.constant 0 : index
    %c0_39 = arith.constant 0 : index
    %114 = vector.load %arg11[%c0_38, %c0_39] : memref<1x32xf32, #tpu.memory_space<vmem>>, vector<1x32xf32>
    %115 = vector.broadcast %114 : vector<1x32xf32> to vector<8x32xf32>
    %116 = arith.addf %113, %115 : vector<8x32xf32>
    %c0_40 = arith.constant 0 : index
    %c0_41 = arith.constant 0 : index
    %117 = vector.load %arg12[%c0_40, %c0_41] : memref<8x32xf32, #tpu.memory_space<vmem>>, vector<8x32xf32>
    tpu.vector_store %arg12[%c0_40, %c0_41], %116 {strides = array<i32>} : memref<8x32xf32, #tpu.memory_space<vmem>>, vector<8x32xf32>,
    return
  }
  func.func @transform_0(%arg0: i32) -> (i32, i32) {
    %c0_i32 = arith.constant 0 : i32
    %c0_i32_0 = arith.constant 0 : i32
    return %arg0, %c0_i32 : i32, i32
  }
  func.func @transform_1(%arg0: i32) -> (i32, i32) {
    %c0_i32 = arith.constant 0 : i32
    %c0_i32_0 = arith.constant 0 : i32
    return %arg0, %c0_i32 : i32, i32
  }
  func.func @transform_2(%arg0: i32) -> (i32, i32) {
    %c0_i32 = arith.constant 0 : i32
    %c0_i32_0 = arith.constant 0 : i32
    return %arg0, %c0_i32 : i32, i32
  }
  func.func @transform_3(%arg0: i32) -> (i32, i32) {
    %c0_i32 = arith.constant 0 : i32
    %c0_i32_0 = arith.constant 0 : i32
    %c0_i32_1 = arith.constant 0 : i32
    return %c0_i32, %c0_i32_0 : i32, i32
  }
  func.func @transform_4(%arg0: i32) -> (i32, i32) {
    %c0_i32 = arith.constant 0 : i32
    %c0_i32_0 = arith.constant 0 : i32
    %c0_i32_1 = arith.constant 0 : i32
    return %c0_i32, %c0_i32_0 : i32, i32
  }
  func.func @transform_5(%arg0: i32) -> (i32, i32) {
    %c0_i32 = arith.constant 0 : i32
    %c0_i32_0 = arith.constant 0 : i32
    %c0_i32_1 = arith.constant 0 : i32
    return %c0_i32, %c0_i32_0 : i32, i32
  }
  func.func @transform_6(%arg0: i32) -> (i32, i32) {
    %c0_i32 = arith.constant 0 : i32
    %c0_i32_0 = arith.constant 0 : i32
    %c0_i32_1 = arith.constant 0 : i32
    return %c0_i32, %c0_i32_0 : i32, i32
  }
  func.func @transform_7(%arg0: i32) -> (i32, i32) {
    %c0_i32 = arith.constant 0 : i32
    %c0_i32_0 = arith.constant 0 : i32
    %c0_i32_1 = arith.constant 0 : i32
    return %c0_i32, %c0_i32_0 : i32, i32
  }
  func.func @transform_8(%arg0: i32) -> (i32, i32) {
    %c0_i32 = arith.constant 0 : i32
    %c0_i32_0 = arith.constant 0 : i32
    %c0_i32_1 = arith.constant 0 : i32
    return %c0_i32, %c0_i32_0 : i32, i32
  }
  func.func @transform_9(%arg0: i32) -> (i32, i32) {
    %c0_i32 = arith.constant 0 : i32
    %c0_i32_0 = arith.constant 0 : i32
    %c0_i32_1 = arith.constant 0 : i32
    return %c0_i32, %c0_i32_0 : i32, i32
  }
  func.func @transform_10(%arg0: i32) -> (i32, i32) {
    %c0_i32 = arith.constant 0 : i32
    %c0_i32_0 = arith.constant 0 : i32
    %c0_i32_1 = arith.constant 0 : i32
    return %c0_i32, %c0_i32_0 : i32, i32
  }
  func.func @transform_11(%arg0: i32) -> (i32, i32) {
    %c0_i32 = arith.constant 0 : i32
    %c0_i32_0 = arith.constant 0 : i32
    return %arg0, %c0_i32 : i32, i32
  }
}

</mosaic_0001>

<bundles_post_ra>
// kernel: tpu_custom_call.1
= control target key start
LH: loop header
LB: loop body
LE: loop exit
PB: predicated region body
PF: predicated region fallthrough
CT: control target
= control target key end

     0   :  { %s2576_s0 = inlined_call_operand.hbm [shape: bf16[16,32], index: 0, kind: input, shape index: {}]   ;;  %s2577_s1 = inlined_call_operand.hbm [shape: bf16[16,32], index: 1, kind: input, shape index: {}]   ;;  %s2578_s2 = inlined_call_operand.hbm [shape: bf16[16,32], index: 2, kind: input, shape index: {}]   ;;  %s2579_s3 = inlined_call_operand.hbm [shape: bf16[32,32], index: 3, kind: input, shape index: {}]   ;;  %s2580_s4 = inlined_call_operand.hbm [shape: f32[1,32], index: 4, kind: input, shape index: {}]   ;;  %s2581_s5 = inlined_call_operand.hbm [shape: bf16[32,32], index: 5, kind: input, shape index: {}]   ;;  %s2582_s6 = inlined_call_operand.hbm [shape: f32[1,32], index: 6, kind: input, shape index: {}]   ;;  %s2583_s7 = inlined_call_operand.hbm [shape: bf16[32,32], index: 7, kind: input, shape index: {}]   ;;  %s2584_s8 = inlined_call_operand.hbm [shape: f32[1,32], index: 8, kind: input, shape index: {}]   ;;  %s2585_s9 = inlined_call_operand.vmem [shape: bf16[32,32], index: 9, kind: input, shape index: {}]   ;;  %s2586_s10 = inlined_call_operand.vmem [shape: f32[1,32], index: 10, kind: input, shape index: {}]   ;;  %s2587_s11 = inlined_call_operand.hbm [shape: f32[16,32], index: 11, kind: output, shape index: {}]  }
   0x1   :  { %2607 = sst [smem:[#allocation30_spill]] %s2579_s3 }
   0x2   :  { %2608 = sst [smem:[#allocation31_spill]] %s2581_s5 }
   0x3   :  { %2609 = sst [smem:[#allocation32_spill]] %s2583_s7 }
   0x4   :  { %2610 = sst [smem:[#allocation33_spill]] %s2586_s10 }
   0x5   :  { %2611 = sst [smem:[#allocation34_spill]] %s2587_s11 }
   0x6   :  { %16 = vsyncpa [#allocation3], 0 }
   0x7   :  { %18 = vsyncpa [#allocation3 + $0x1], 0 }
   0x8   :  { %19 = vsyncpa [#allocation6], 0 }
   0x9   :  { %21 = vsyncpa [#allocation6 + $0x1], 0 }
   0xa   :  { %22 = vsyncpa [#allocation9], 0 }
   0xb   :  { %23 = vsyncpa [#allocation12], 0 }
   0xc   :  { %24 = vsyncpa [#allocation15], 0 }
   0xd   :  { %25 = vsyncpa [#allocation4], 0 }
   0xe   :  { %27 = vsyncpa [#allocation4 + $0x1], 0  ;;  %s2183_s17 = smov 0   ;;  %s2185_s18 = smov 0  }
   0xf   :  { %s2187_s19 = smov 0   ;;  %s2189_s20 = smov 0  }
  0x10 LB: > { %2612 = sst [smem:[#allocation24_spill]] %s2089_s17  ;;  %s2103_s21 = smov [#allocation8]   ;;  %s2101_s20 = sphi %s2189_s20, %s2650_s20   ;;  %s2097_s19 = sphi %s2187_s19, %s2654_s19   ;;  %s2093_s18 = sphi %s2185_s18, %s2653_s18   ;;  %s2089_s17 = sphi %s2183_s17, %s2652_s17  }
  0x11   : > { %2613 = sst [smem:[#allocation25_spill]] %s2101_s20  ;;  %s322_s22 = sshll.u32 %s2103_s21, 4  ;;  %s323_s22 = int_to_ptr.vmem [resolvable:$true] %s322_s22 }
  0x12   : > { %s2204_s23 = sadd.s32 4294967295, %s2101_s20   ;;  %p1469_p0 = scmp.ge.s32.totalorder %s2101_s20, 1 }
  0x13   : > { %p2595_p1 = scmp.eq.s32.totalorder %s2204_s23, 0  ;;  %p310_p2 = scmp.lt.s32.totalorder %s2101_s20, 3 }
  0x14   : > { %s2104_s25 = smov [#allocation11]   ;;  %s2105_s28 = smov [#allocation14]  }
  0x15   : > { %p2209_p3 = pnand %p1469_p0, %p310_p2  ;;  %s346_s26 = sshll.u32 %s2104_s25, 4  ;;  %s2222_s26 = int_to_ptr.vmem [resolvable:$true] %s346_s26 }
  0x16   : > { %s370_s29 = sshll.u32 %s2105_s28, 4  ;;  %s1792_s12 = scalar_lea.vmem %s323_s22, 256  ;;  %s2224_s29 = int_to_ptr.vmem [resolvable:$true] %s370_s29 }
  0x17   : > { %s2614_s24 = scalar_select %p2209_p3, 1, 0 }
  0x18   : > { %p1662_p5 = pneg %p2209_p3  ;;  %p1793_p8 = scmp.ne.s32.totalorder %s323_s22, %s1792_s12 }
  0x19   : > { %p1800_p11 = scmp.lt.s32.totalorder %s323_s22, %s323_s22  ;;  %p1801_p12 = scmp.lt.s32.totalorder %s1792_s12, %s1792_s12 }
  0x1a   : > { %p2218_p6 = pnand %p1662_p5, %p2595_p1 }
  0x1b   : > { %p1802_p13 = por %p1801_p12, %p1800_p11 }
  0x1c   : > { %s2615_s27 = scalar_select %p2218_p6, 1, 0 }
  0x1d   : > { %p2228_p7 = pneg %p2218_p6 }
  0x1f   : > { %s2616_s30 = scalar_select %p2228_p7, 1, 0 }
  0x20   : > { %p1795_p9 = pnand %p1793_p8, %p2228_p7 }
  0x22   : > { %p1796_p10 = pneg %p1795_p9 }
  0x24   : > { %p1803_p0 = pnand %p1802_p13, %p1796_p10 }
  0x26   : > { %1806 = shalt.err (!%p1803_p0)
}
  0x27   : > { %s2106_s13 = smov 64   ;;  %s2107_s14 = smov 4  }
  0x28   : > { %s2617_s3 = sld [smem:[#allocation30_spill]]  ;;  %s1818_s21 = scalar_lea.vmem %s2222_s26, 256 }
  0x29   : > { %p1819_p2 = scmp.ne.s32.totalorder %s2222_s26, %s1818_s21  ;;  %p1826_p9 = scmp.lt.s32.totalorder %s2222_s26, %s2222_s26 }
  0x2a   : > { %p1827_p10 = scmp.lt.s32.totalorder %s1818_s21, %s1818_s21 }
  0x2b   : > { %p1821_p5 = pnand %p1819_p2, %p2228_p7 }
  0x2c   : > { %p1828_p11 = por %p1827_p10, %p1826_p9 }
  0x2d   : > { %p1822_p8 = pneg %p1821_p5 }
  0x2e   : > { %1665 = dma.hbm_to_vmem [thread:$0]  (!%p2218_p6), %s2617_s3, 256, %s323_s22, [#allocation9], %s2106_s13, %s2106_s13, %s2107_s14  }
  0x2f   : > { %p1829_p12 = pnand %p1828_p11, %p1822_p8 }
  0x31   : > { %1832 = shalt.err (!%p1829_p12)
}
  0x32   : > { %s2618_s5 = sld [smem:[#allocation31_spill]]  ;;  %s1844_s22 = scalar_lea.vmem %s2224_s29, 256 }
  0x33   : > { %p1845_p13 = scmp.ne.s32.totalorder %s2224_s29, %s1844_s22  ;;  %p1852_p5 = scmp.lt.s32.totalorder %s2224_s29, %s2224_s29 }
  0x34   : > { %p1853_p8 = scmp.lt.s32.totalorder %s1844_s22, %s1844_s22 }
  0x35   : > { %p1847_p0 = pnand %p1845_p13, %p2228_p7 }
  0x36   : > { %p1854_p9 = por %p1853_p8, %p1852_p5 }
  0x37   : > { %p1848_p2 = pneg %p1847_p0 }
  0x38   : > { %1671 = dma.hbm_to_vmem [thread:$0]  (!%p2218_p6), %s2618_s5, 256, %s2222_s26, [#allocation12], %s2106_s13, %s2106_s13, %s2107_s14  }
  0x39   : > { %p1855_p10 = pnand %p1854_p9, %p1848_p2 }
  0x3b   : > { %1858 = shalt.err (!%p1855_p10)
}
  0x3c   : > { %s2619_s7 = sld [smem:[#allocation32_spill]]  ;;  %s1468_s26 = sadd.s32 4294967294, %s2101_s20  }
  0x3d   : > { %s2265_s16 = sadd.s32 1, %s2101_s20   ;;  %s40_s21 = sadd.s32 1, %s2097_s19 }
  0x3e   : > { %2620 = sst [smem:[#allocation26_spill]] %s2265_s16  ;;  %s37_s25 = ssub.s32 %s2101_s20, %s2265_s16 }
  0x3f   : > { %p47_p11 = scmp.ne.s32.totalorder %s2097_s19, %s2093_s18  ;;  %p38_p12 = scmp.eq.s32.totalorder %s37_s25, 0 }
  0x40   : > { %p48_p13 = scmp.eq.s32.totalorder %s2101_s20, 0  ;;  %p53_p0 = scmp.ne.s32.totalorder %s2093_s18, %s2089_s17 }
  0x41   : > { %p297_p2 = scmp.eq.s32.totalorder %s2204_s23, 1  ;;  %p303_p10 = scmp.eq.s32.totalorder %s1468_s26, 1 }
  0x42   : > { %1677 = dma.hbm_to_vmem [thread:$0]  (!%p2218_p6), %s2619_s7, 256, %s2224_s29, [#allocation15], %s2106_s13, %s2106_s13, %s2107_s14  }
  0x43   : > { %s2277_s28 = scalar_select %p38_p12, %s2097_s19, %s40_s21  }
  0x44   : > { %p49_p5 = por %p48_p13, %p47_p11  ;;  %p2281_p8 = por %p2595_p1, %p53_p0 }
  0x45   : > { %2621 = sst [smem:[#allocation27_spill]] %s2277_s28  ;;  %p2285_p9 = por %p297_p2, %p47_p11 }
  0x46   : > { %s2622_s29 = scalar_select %p2281_p8, 1, 0 }
  0x47   : > { %s2623_s13 = scalar_select %p2285_p9, 1, 0 }
  0x48   : > { %p1701_p4 = scmp.lt.s32.totalorder %s2101_s20, 2  ;;  %s2589_s14 = sand.u32 1, %s2097_s19  }
  0x49   : > { %2624 = sst [smem:[#allocation28_spill]] %s2623_s13  ;;  %p2291_p3 = por %p303_p10, %p53_p0 }
  0x4a   : > { %s2297_s12 = sshll.u32 %s2589_s14, 2  ;;  %s2300_s15 = sshll.u32 %s2101_s20, 6 }
  0x4b   : > { %s2625_s22 = scalar_select %p2291_p3, 1, 0 }
  0x4c   : > { %p2302_p12 = pnand %p1701_p4, %p49_p5  ;;  %s419_s25 = sand.u32 1, %s2101_s20  }
  0x4d   : > { %2626 = sst [smem:[#allocation29_spill]] %s2625_s22  ;;  %s2311_s5 = scalar_lea.hbm %s2577_s1, %s2300_s15 }
  0x4e   : > { %s2627_s21 = scalar_select %p2302_p12, 1, 0 }
  0x4f   : > { %s423_s14 = scalar_lea.vmem [#allocation5], %s2297_s12  ;;  %s2314_s28 = scalar_lea.sflag [#allocation6], %s419_s25 }
  0x50   : > { %s430_s7 = sshll.u32 %s423_s14, 4  ;;  %s1859_s16 = scalar_lea.hbm %s2311_s5, 64  ;;  %s431_s7 = int_to_ptr.vmem [resolvable:$true] %s430_s7 }
  0x51   : > { %p1860_p4 = scmp.ne.s32.totalorder %s2311_s5, %s1859_s16  ;;  %p2320_p11 = pneg %p2302_p12 }
  0x52   : > { %s1864_s20 = scalar_lea.hbm %s2577_s1, 128  ;;  %p1865_p2 = scmp.lt.s32.totalorder %s2311_s5, %s2577_s1 }
  0x53   : > { %p1862_p13 = pnand %p2320_p11, %p1860_p4  ;;  %p1866_p5 = scmp.lt.s32.totalorder %s1864_s20, %s1859_s16 }
  0x55   : > { %p1863_p0 = pneg %p1862_p13  ;;  %p1867_p10 = por %p1866_p5, %p1865_p2 }
  0x57   : > { %p1868_p1 = pnand %p1867_p10, %p1863_p0 }
  0x59   : > { %1871 = shalt.err (!%p1868_p1)
}
  0x5a   : > { %s1872_s25 = scalar_lea.vmem %s431_s7, 64  ;;  %s2108_s11 = smov [#allocation5]  }
  0x5b   : > { %p1873_p3 = scmp.ne.s32.totalorder %s431_s7, %s1872_s25  ;;  %s1877_s10 = sshll.u32 %s2108_s11, 4  ;;  %s1878_s10 = int_to_ptr.vmem [resolvable:$false] %s1877_s10 }
  0x5c   : > { %s1879_s13 = scalar_lea.vmem %s1878_s10, 128  ;;  %p1880_p4 = scmp.lt.s32.totalorder %s431_s7, %s1878_s10 }
  0x5d   : > { %p1875_p9 = pnand %p1873_p3, %p2320_p11  ;;  %p1881_p13 = scmp.lt.s32.totalorder %s1879_s13, %s1872_s25 }
  0x5f   : > { %p1876_p8 = pneg %p1875_p9  ;;  %p1882_p6 = por %p1881_p13, %p1880_p4 }
  0x61   : > { %p1883_p7 = pnand %p1882_p6, %p1876_p8 }
  0x63   : > { %1886 = shalt.err (!%p1883_p7)
}
  0x64   : > { %1687 = dma.hbm_to_vmem [thread:$0]  (!%p2302_p12), %s2311_s5, 64, %s431_s7, %s2314_s28  }
  0x65   : > { %s2109_s17 = smov [#allocation10]   ;;  %s2110_s16 = smov [#allocation13]  }
  0x66   : > { %s336_s20 = sshll.u32 %s2109_s17, 4  ;;  %s360_s3 = sshll.u32 %s2110_s16, 4  ;;  %s337_s20 = int_to_ptr.vmem [resolvable:$true] %s336_s20  ;;  %s361_s3 = int_to_ptr.vmem [resolvable:$true] %s360_s3 }
  0x67   : > { %s1898_s26 = scalar_lea.vmem %s337_s20, 16  ;;  %p2629_p3 = scmp.ne.s32.totalorder %s2616_s30, 0 }
  0x68   : > { %p1899_p1 = scmp.ne.s32.totalorder %s337_s20, %s1898_s26  ;;  %s1905_s10 = scalar_lea.vmem %s337_s20, 32 }
  0x69   : > { %p1906_p2 = scmp.lt.s32.totalorder %s337_s20, %s337_s20  ;;  %p1907_p6 = scmp.lt.s32.totalorder %s1905_s10, %s1898_s26 }
  0x6a   : > { %p1901_p9 = pnand %p1899_p1, %p2629_p3 }
  0x6b   : > { %p1908_p7 = por %p1907_p6, %p1906_p2 }
  0x6c   : > { %p1902_p0 = pneg %p1901_p9 }
  0x6e   : > { %p1909_p8 = pnand %p1908_p7, %p1902_p0 }
  0x70   : > { %1912 = shalt.err (!%p1909_p8)
}
  0x71   : > { %p2630_p5 = scmp.ne.s32.totalorder %s2615_s27, 0  ;;  %s1924_s7 = scalar_lea.vmem %s361_s3, 16 }
  0x72   : > { %p1925_p10 = scmp.ne.s32.totalorder %s361_s3, %s1924_s7  ;;  %s1931_s13 = scalar_lea.vmem %s361_s3, 32 }
  0x73   : > { %1668 = dma.hbm_to_vmem [thread:$0]  (!%p2630_p5), %s2580_s4, 16, %s337_s20, [#allocation9]  }
  0x74   : > { %p1927_p4 = pnand %p1925_p10, %p2629_p3  ;;  %p1932_p1 = scmp.lt.s32.totalorder %s361_s3, %s361_s3 }
  0x75   : > { %p1933_p9 = scmp.lt.s32.totalorder %s1931_s13, %s1924_s7 }
  0x76   : > { %p1928_p13 = pneg %p1927_p4 }
  0x77   : > { %p1934_p12 = por %p1933_p9, %p1932_p1 }
  0x79   : > { %p1935_p2 = pnand %p1934_p12, %p1928_p13 }
  0x7b   : > { %1938 = shalt.err (!%p1935_p2)
}
  0x7c   : > { %1674 = dma.hbm_to_vmem [thread:$0]  (!%p2630_p5), %s2582_s6, 16, %s361_s3, [#allocation12]  }
  0x7d   : > { %s2111_s17 = smov [#allocation16]  }
  0x7e   : > { %s384_s20 = sshll.u32 %s2111_s17, 4  ;;  %s385_s20 = int_to_ptr.vmem [resolvable:$true] %s384_s20 }
  0x7f   : > { %s1950_s16 = scalar_lea.vmem %s385_s20, 16  ;;  %s1957_s26 = scalar_lea.vmem %s385_s20, 32 }
  0x80   : > { %p1951_p0 = scmp.ne.s32.totalorder %s385_s20, %s1950_s16  ;;  %p1958_p8 = scmp.lt.s32.totalorder %s385_s20, %s385_s20 }
  0x81   : > { %p1959_p10 = scmp.lt.s32.totalorder %s1957_s26, %s1950_s16 }
  0x82   : > { %p1953_p6 = pnand %p1951_p0, %p2629_p3 }
  0x83   : > { %p1960_p12 = por %p1959_p10, %p1958_p8 }
  0x84   : > { %p1954_p7 = pneg %p1953_p6 }
  0x86   : > { %p1961_p4 = pnand %p1960_p12, %p1954_p7 }
  0x88   : > { %1964 = shalt.err (!%p1961_p4)
}
  0x89   : > { %1680 = dma.hbm_to_vmem [thread:$0]  (!%p2630_p5), %s2584_s8, 16, %s385_s20, [#allocation15]  }
  0x8a   : > { %s2364_s5 = scalar_lea.hbm %s2576_s0, %s2300_s15  ;;  %s405_s7 = scalar_lea.vmem [#allocation2], %s2297_s12 }
  0x8b   : > { %s412_s13 = sshll.u32 %s405_s7, 4  ;;  %s2631_s27 = sand.u32 1, %s2097_s19   ;;  %s413_s13 = int_to_ptr.vmem [resolvable:$true] %s412_s13 }
  0x8c   : > { %s402_s14 = scalar_lea.sflag [#allocation3], %s2631_s27  ;;  %s1965_s25 = scalar_lea.hbm %s2364_s5, 64 }
  0x8d   : > { %p1966_p3 = scmp.ne.s32.totalorder %s2364_s5, %s1965_s25  ;;  %s1970_s16 = scalar_lea.hbm %s2576_s0, 128 }
  0x8e   : > { %p1971_p5 = scmp.lt.s32.totalorder %s2364_s5, %s2576_s0  ;;  %p1972_p9 = scmp.lt.s32.totalorder %s1970_s16, %s1965_s25 }
  0x8f   : > { %p1968_p13 = pnand %p1966_p3, %p2320_p11 }
  0x90   : > { %p1973_p2 = por %p1972_p9, %p1971_p5 }
  0x91   : > { %p1969_p1 = pneg %p1968_p13 }
  0x93   : > { %p1974_p0 = pnand %p1973_p2, %p1969_p1 }
  0x95   : > { %1977 = shalt.err (!%p1974_p0)
}
  0x96   : > { %s1978_s11 = scalar_lea.vmem %s413_s13, 64  ;;  %s2112_s3 = smov [#allocation2]  }
  0x97   : > { %p1979_p6 = scmp.ne.s32.totalorder %s413_s13, %s1978_s11  ;;  %s1983_s30 = sshll.u32 %s2112_s3, 4  ;;  %s1984_s30 = int_to_ptr.vmem [resolvable:$false] %s1983_s30 }
  0x98   : > { %s1985_s7 = scalar_lea.vmem %s1984_s30, 128  ;;  %p1986_p10 = scmp.lt.s32.totalorder %s413_s13, %s1984_s30 }
  0x99   : > { %p1981_p7 = pnand %p1979_p6, %p2320_p11  ;;  %p1987_p12 = scmp.lt.s32.totalorder %s1985_s7, %s1978_s11 }
  0x9b   : > { %p1982_p8 = pneg %p1981_p7  ;;  %p1988_p4 = por %p1987_p12, %p1986_p10 }
  0x9d   : > { %p1989_p3 = pnand %p1988_p4, %p1982_p8 }
  0x9f   : > { %1992 = shalt.err (!%p1989_p3)
}
  0xa0   : > { %p2632_p13 = scmp.ne.s32.totalorder %s2627_s21, 0  ;;  %s446_s17 = scalar_lea.hbm %s2578_s2, %s2300_s15 }
  0xa1   : > { %s441_s20 = scalar_lea.vmem [#allocation7], %s2297_s12  ;;  %s1993_s26 = scalar_lea.hbm %s446_s17, 64 }
  0xa2   : > { %1684 = dma.hbm_to_vmem [thread:$0]  (!%p2632_p13), %s2364_s5, 64, %s413_s13, %s402_s14  }
  0xa3   : > { %s448_s16 = sshll.u32 %s441_s20, 4  ;;  %p1994_p1 = scmp.ne.s32.totalorder %s446_s17, %s1993_s26  ;;  %s449_s16 = int_to_ptr.vmem [resolvable:$true] %s448_s16 }
  0xa4   : > { %s1998_s3 = scalar_lea.hbm %s2578_s2, 128  ;;  %p1999_p2 = scmp.lt.s32.totalorder %s446_s17, %s2578_s2 }
  0xa5   : > { %p1996_p5 = pnand %p1994_p1, %p2320_p11  ;;  %p2000_p0 = scmp.lt.s32.totalorder %s1998_s3, %s1993_s26 }
  0xa7   : > { %p1997_p9 = pneg %p1996_p5  ;;  %p2001_p6 = por %p2000_p0, %p1999_p2 }
  0xa9   : > { %p2002_p7 = pnand %p2001_p6, %p1997_p9 }
  0xab   : > { %2005 = shalt.err (!%p2002_p7)
}
  0xac   : > { %s2006_s12 = scalar_lea.vmem %s449_s16, 64  ;;  %s2113_s15 = smov [#allocation7]  }
  0xad   : > { %p2007_p8 = scmp.ne.s32.totalorder %s449_s16, %s2006_s12  ;;  %s2011_s5 = sshll.u32 %s2113_s15, 4  ;;  %s2012_s5 = int_to_ptr.vmem [resolvable:$false] %s2011_s5 }
  0xae   : > { %s2013_s13 = scalar_lea.vmem %s2012_s5, 128  ;;  %p2014_p4 = scmp.lt.s32.totalorder %s449_s16, %s2012_s5 }
  0xaf   : > { %p2009_p10 = pnand %p2007_p8, %p2320_p11  ;;  %p2015_p3 = scmp.lt.s32.totalorder %s2013_s13, %s2006_s12 }
  0xb1   : > { %p2010_p12 = pneg %p2009_p10  ;;  %p2016_p1 = por %p2015_p3, %p2014_p4 }
  0xb3   : > { %p2017_p5 = pnand %p2016_p1, %p2010_p12 }
  0xb5   : > { %2020 = shalt.err (!%p2017_p5)
}
  0xb6   : > { %1690 = dma.hbm_to_vmem [thread:$0]  (!%p2632_p13), %s446_s17, 64, %s449_s16, %s2314_s28  }
  0xb7   : > { %p2633_p9 = scmp.ne.s32.totalorder %s2614_s24, 0 }
  0xb8   : > { %s2406_s22 = sand.u32 (!%p2633_p9), 1, %s2093_s18   ;;  %p2634_p11 = scmp.ne.s32.totalorder (!%p2633_p9), %s2622_s29, 0 }
  0xb9   : > { %457 = sbr.rel (%p2633_p9) target bundleno = 1424 (0x590), region = 64  ;;  %s2409_s14 = sshll.u32 (!%p2633_p9), %s2406_s22, 2 }
  0xba   : > { %s460_s27 = scalar_lea.sflag (!%p2633_p9), [#allocation3], %s2406_s22  ;;  %s463_s25 = scalar_lea.vmem (!%p2633_p9), [#allocation2], %s2409_s14 }
  0xbe   : > { %2064 = dma.done.wait (%p2634_p11), %s460_s27, 64  }
  0xbf   : > { %2066 = vsyncadd (%p2634_p11), %s460_s27, 4294967232  ;;  %s468_s24 = sand.u32 1, %s2204_s23   ;;  %s472_s21 = scalar_lea.vmem [#allocation5], %s2409_s14 }
  0xc0   : > { %s469_s28 = scalar_lea.sflag [#allocation6], %s468_s24 }
  0xc1   : > { %2068 = dma.done.wait (%p2634_p11), %s469_s28, 128  }
  0xc2   : > { %2070 = vsyncadd (%p2634_p11), %s469_s28, 4294967168  ;;  %s481_s17 = scalar_lea.vmem [#allocation7], %s2409_s14  ;;  %p2635_p13 = scmp.eq.s32.totalorder %s2204_s23, 0 }
  0xc4   : > { %2072 = dma.done.wait (%p2635_p13), [#allocation9], 272   ;;  %p2636_p2 = pmov %p2635_p13 }
  0xc6   : > { %2074 = vsyncadd (%p2636_p2), [#allocation9], 4294967024  ;;  %p2637_p0 = pmov %p2636_p2 }
  0xc8   : > { %2076 = dma.done.wait (%p2637_p0), [#allocation12], 272   ;;  %p2638_p6 = pmov %p2637_p0 }
  0xc9   : > { %p2639_p7 = pmov %p2637_p0 }
  0xca   : > { %2078 = vsyncadd (%p2638_p6), [#allocation12], 4294967024 }
  0xcb   : > { %2080 = dma.done.wait (%p2639_p7), [#allocation15], 272   ;;  %p2640_p8 = pmov %p2637_p0 }
  0xcc   : > { %v2114_v0 = vmov 0.0   ;;  %vm2115_vm0 = vmmov 0   ;;  %v1757_v1 = vld [vmem:[#allocation11 + $0x8] sm:$0xff]   ;;  %v1758_v2 = vld [vmem:[#allocation8 + $0x8] sm:$0xff]   ;;  %v1759_v3 = vld [vmem:[#allocation11] sm:$0xff]   ;;  %vm581_vm1 = vcmask 261120  }
  0xcd   : > { %2082 = vsyncadd (%p2640_p8), [#allocation15], 4294967024  ;;  %1558 = vmatprep.subr.bf16.mxu1 %v2114_v0  ;;  %1550 = vmatprep.subr.bf16.mxu0 %v2114_v0  ;;  %v1760_v4 = vld [vmem:[#allocation8] sm:$0xff]   ;;  %v556_v5 = vld [vmem:[%s472_s21] sm:$0xf]  ;;  %vm760_vm2 = vcmask 64512  }
  0xce   : > { %1562 = vmatprep.mubr.msk.bf16.mxu1 %vm2115_vm0, %v2114_v0  ;;  %1554 = vmatprep.mubr.msk.bf16.mxu0 %vm2115_vm0, %v2114_v0  ;;  %v555_v6 = vld [vmem:[%s463_s25] sm:$0xf]  ;;  %v1498_v7 = vld [vmem:[#allocation13] ss:$0 sm:$0xff]  ;;  %v1494_v8 = vld [vmem:[#allocation10] ss:$0 sm:$0xff] }
  0xcf   : > { %1559 = vmatpush3.bf16.msra.mxu1 %v1757_v1  ;;  %1551 = vmatpush3.bf16.msra.mxu0 %v1758_v2  ;;  %s2116_s29 = smov 112   ;;  %s2117_s20 = smov 120   ;;  %v1761_v22 = vld [vmem:[#allocation14 + $0x8] sm:$0xff]   ;;  %v1762_v23 = vld [vmem:[#allocation14] sm:$0xff]   ;;  %v557_v24 = vld [vmem:[%s481_s17] sm:$0xf] }
  0xd0   : > { %1560 = vmatprep.subr.bf16.mxu1 %v2114_v0  ;;  %1552 = vmatprep.subr.bf16.mxu0 %v2114_v0  ;;  %s2118_s16 = smov 104   ;;  %v1502_v39 = vld [vmem:[#allocation16] ss:$0 sm:$0xff]  ;;  %vm820_vm3 = vcmask 1043456   ;;  %s2119_s11 = smov 8   ;;  %vm1212_vm4 = vcmask 130048  }
  0xd1   : > { %s2120_s7 = smov 16   ;;  %s2121_s12 = smov 24   ;;  %vm1214_vm5 = vcmask 195584  }
  0xd2   : > { %s2641_s15 = sld [smem:[#allocation28_spill]]  ;;  %s1493_s5 = sshll.u32 %s2406_s22, 3 }
  0xd3   : > { %1561 = vmatpush3.bf16.msra.mxu1 %v1759_v3  ;;  %1553 = vmatpush3.bf16.msra.mxu0 %v1760_v4  ;;  %s2642_s27 = sld [smem:[#allocation33_spill]]  ;;  %s1519_s25 = sshll.u32 %s2204_s23, 7 }
  0xd4   : > { %1574 = vmatprep.subr.bf16.mxu1 %v2114_v0  ;;  %1566 = vmatprep.subr.bf16.mxu0 %v2114_v0  ;;  %s553_s24 = scalar_lea.vmem [#allocation17], %s1493_s5  ;;  %s2122_s26 = smov [#allocation17]  }
  0xd5   : > { %s1298_s28 = sshll.u32 %s553_s24, 4  ;;  %s2025_s10 = sshll.u32 %s2122_s26, 4  ;;  %s2534_s28 = int_to_ptr.vmem [resolvable:$true] %s1298_s28  ;;  %s2026_s10 = int_to_ptr.vmem [resolvable:$false] %s2025_s10 }
  0xd6   : > { %1563 = vmatmul.mubr.msk.bf16.vlgmr.msra.gmra.mxu1 %vm581_vm1, %v556_v5  ;;  %1555 = vmatmul.mubr.msk.bf16.vlgmr.msra.gmra.mxu0 %vm581_vm1, %v555_v6  ;;  %s2021_s23 = scalar_lea.vmem %s2534_s28, 128  ;;  %p2028_p1 = scmp.lt.s32.totalorder %s2534_s28, %s2026_s10 }
  0xd7   : > { %1576 = vmatprep.mubr.msk.bf16.mxu1 %vm2115_vm0, %v2114_v0  ;;  %1570 = vmatprep.mubr.msk.bf16.mxu0 %vm2115_vm0, %v2114_v0  ;;  %p2022_p10 = scmp.ne.s32.totalorder %s2534_s28, %s2021_s23 }
  0xd8   : > { %1567 = vmatpush3.bf16.msra.mxu0 %v1761_v22  ;;  %p2644_p12 = scmp.ne.s32.totalorder %s2641_s15, 0 }
  0xd9   : > { %1568 = vmatprep.subr.bf16.mxu0 %v2114_v0 }
  0xda   : > { %p2023_p4 = pnand %p2022_p10, %p2644_p12 }
  0xdc   : > { %1569 = vmatpush3.bf16.msra.mxu0 %v1762_v23  ;;  %p2024_p3 = pneg %p2023_p4 }
  0xdd   : > { %1580 = vmatprep.subr.bf16.mxu0 %v2114_v0 }
  0xdf   : > { %1571 = vmatmul.mubr.msk.bf16.vlgmr.msra.gmra.mxu0 %vm581_vm1, %v557_v24 }
  0xe0   : > { %1582 = vmatprep.mubr.msk.bf16.mxu0 %vm2115_vm0, %v2114_v0 }
 0x196   : > { %v685_v9 = vpop.f32.mrf.mxu1  ;;  %v619_v11 = vpop.f32.mrf.mxu0 }
 0x197   : > { %v686_v10 = vadd.f32 %v1498_v7, %v685_v9  ;;  %v620_v12 = vadd.f32 %v1494_v8, %v619_v11 }
 0x198   : > { %v1564_v13 = vpop.f32.mrf.mxu1  ;;  %v1556_v15 = vpop.f32.mrf.mxu0 }
 0x199   : > { %v758_v14 = vpack.c.bf16 %v686_v10, %v686_v10  ;;  %v757_v17 = vpack.c.bf16 %v620_v12, %v620_v12 }
 0x19a   : > { %v688_v16 = vpop.f32.mrf.mxu1  ;;  %v622_v18 = vpop.f32.mrf.mxu0 }
 0x19b   : > { %981 = vrot.lane.b32.xlu1 %v758_v14, %s2116_s29  ;;  %870 = vrot.lane.b32.xlu0 %v758_v14, %s2117_s20  ;;  %v765_v19 = vsel %vm760_vm2, %v758_v14, 0 }
 0x19c   : > { %v1565_v20 = vpop.f32.mrf.mxu1  ;;  %1575 = vmatpush3.bf16.xpose.msra.mxu1 %v765_v19  ;;  %v1557_v21 = vpop.f32.mrf.mxu0 }
 0x19d   : > { %1586 = vmatprep.subr.bf16.mxu1 %v2114_v0 }
 0x19f   : > { %979 = vrot.lane.b32.xlu1 %v757_v17, %s2116_s29  ;;  %867 = vrot.lane.b32.xlu0 %v757_v17, %s2117_s20  ;;  %v751_v40 = vpop.f32.mrf.mxu0 }
 0x1a0   : > { %v752_v41 = vadd.f32 %v1502_v39, %v751_v40 }
 0x1a1   : > { %v1572_v42 = vpop.f32.mrf.mxu0 }
 0x1a2   : > { %v759_v43 = vpack.c.bf16 %v752_v41, %v752_v41  ;;  %v1764_v42 = vld [vmem:[%s2585_s9] sm:$0xff]  }
 0x1a3   : > { %1089 = vrot.lane.b32.xlu1 %v757_v17, %s2118_s16  ;;  %1091 = vrot.lane.b32.xlu0 %v758_v14, %s2118_s16  ;;  %v754_v44 = vpop.f32.mrf.mxu0 }
 0x1a4   : > { %1577 = vmatmul.mubr.msk.bf16.vlgmr.msra.gmra.mxu1 %vm760_vm2, %v757_v17  ;;  %v822_v45 = vsel %vm820_vm3, %v759_v43, 0 }
 0x1a5   : > { %1588 = vmatprep.mubr.msk.bf16.mxu1 %vm2115_vm0, %v2114_v0  ;;  %v1573_v46 = vpop.f32.mrf.mxu0  ;;  %1581 = vmatpush3.bf16.msra.mxu0 %v822_v45 }
 0x1a6   : > { %1592 = vmatprep.subr.bf16.mxu0 %v2114_v0 }
 0x20d   : > { %v871_v25 = vpop.permute.xlu0 %870  ;;  %v982_v27 = vpop.permute.xlu1 %981 }
 0x20e   : > { %v876_v26 = vsel %vm760_vm2, %v871_v25, 0  ;;  %v987_v29 = vsel %vm760_vm2, %v982_v27, 0 }
 0x20f   : > { %1587 = vmatpush3.bf16.xpose.msra.mxu1 %v876_v26 }
 0x210   : > { %1598 = vmatprep.subr.bf16.mxu1 %v2114_v0 }
 0x211   : > { %v868_v28 = vpop.permute.xlu0 %867  ;;  %v980_v31 = vpop.permute.xlu1 %979 }
 0x215   : > { %v1092_v30 = vpop.permute.xlu0 %1091  ;;  %v1090_v33 = vpop.permute.xlu1 %1089 }
 0x216   : > { %1589 = vmatmul.mubr.msk.bf16.vlgmr.msra.gmra.mxu1 %vm760_vm2, %v868_v28  ;;  %v1097_v32 = vsel %vm760_vm2, %v1092_v30, 0 }
 0x217   : > { %1599 = vmatpush3.bf16.xpose.msra.mxu1 %v987_v29  ;;  %1600 = vmatprep.mubr.msk.bf16.mxu1 %vm2115_vm0, %v2114_v0 }
 0x218   : > { %1610 = vmatprep.subr.bf16.mxu1 %v2114_v0 }
 0x21e   : > { %1601 = vmatmul.mubr.msk.bf16.vlgmr.msra.gmra.mxu1 %vm760_vm2, %v980_v31 }
 0x21f   : > { %1611 = vmatpush3.bf16.xpose.msra.mxu1 %v1097_v32  ;;  %1612 = vmatprep.mubr.msk.bf16.mxu1 %vm2115_vm0, %v2114_v0 }
 0x220   : > { %1622 = vmatprep.subr.bf16.mxu1 %v2114_v0 }
 0x226   : > { %1613 = vmatmul.mubr.msk.bf16.vlgmr.msra.gmra.mxu1 %vm760_vm2, %v1090_v33 }
 0x227   : > { %1626 = vmatprep.mubr.msk.bf16.mxu1 %vm2115_vm0, %v2114_v0 }
 0x264   : > { %v801_v34 = vpop.f32.mrf.mxu1 }
 0x265   : > { %v807_v35 = vsel %vm760_vm2, %v801_v34, -inf }
 0x266   : > { %808 = vmax.xlane.f32.xlu0 %v807_v35  ;;  %v1578_v36 = vpop.f32.mrf.mxu1  ;;  %v1763_v35 = vld [vmem:[%s2585_s9 + $0x8] sm:$0xff]  }
 0x267   : > { %1623 = vmatpush3.bf16.msra.mxu1 %v1763_v35 }
 0x268   : > { %v804_v37 = vpop.f32.mrf.mxu1  ;;  %1624 = vmatprep.subr.bf16.mxu1 %v2114_v0 }
 0x26a   : > { %v1579_v38 = vpop.f32.mrf.mxu1 }
 0x26b   : > { %1625 = vmatpush3.bf16.msra.mxu1 %v1764_v42 }
 0x2d6   : > { %v912_v47 = vpop.f32.mrf.mxu1 }
 0x2d7   : > { %v918_v48 = vsel %vm760_vm2, %v912_v47, -inf }
 0x2d8   : > { %919 = vmax.xlane.f32.xlu1 %v918_v48  ;;  %v1590_v49 = vpop.f32.mrf.mxu1 }
 0x2da   : > { %v915_v50 = vpop.f32.mrf.mxu1 }
 0x2dc   : > { %v1591_v51 = vpop.f32.mrf.mxu1 }
 0x2de   : > { %v1023_v52 = vpop.f32.mrf.mxu1 }
 0x2df   : > { %v1029_v53 = vsel %vm760_vm2, %v1023_v52, -inf }
 0x2e0   : > { %1030 = vmax.xlane.f32.xlu0 %v1029_v53  ;;  %v1602_v54 = vpop.f32.mrf.mxu1 }
 0x2e2   : > { %v1026_v55 = vpop.f32.mrf.mxu1 }
 0x2e4   : > { %v1603_v56 = vpop.f32.mrf.mxu1 }
 0x2e6   : > { %v1133_v57 = vpop.f32.mrf.mxu1 }
 0x2e7   : > { %v1139_v58 = vsel %vm760_vm2, %v1133_v57, -inf }
 0x2e8   : > { %1140 = vmax.xlane.f32.xlu0 %v1139_v58  ;;  %v1614_v59 = vpop.f32.mrf.mxu1 }
 0x2e9   : > { %929 = vrot.lane.b32.xlu1 %v759_v43, %s2117_s20 }
 0x2ea   : > { %v1136_v60 = vpop.f32.mrf.mxu1 }
 0x2ec   : > { %v1615_v61 = vpop.f32.mrf.mxu1 }
 0x2ed   : > { %1149 = vrot.lane.b32.xlu1 %v759_v43, %s2118_s16  ;;  %s1285_s16 = scalar_lea.sflag [#allocation4], %s2406_s22 }
 0x2ef   : > { %v809_v62 = vpop.xlane.xlu0 %808 }
 0x2f0   : > { %v810_v63 = vsub.f32 %v801_v34, %v809_v62 }
 0x2f2   : > { %v811_v1 = vmul.f32 1.442695, %v810_v63 }
 0x2f4   : > { %1765 = vpow2.f32 %v811_v1 }
 0x2fe   : > { %1039 = vrot.lane.b32.xlu0 %v759_v43, %s2116_s29  ;;  %s2643_s29 = sld [smem:[#allocation34_spill]] }
 0x301   : > { %v1766_v2 = vpop.eup %1765 }
 0x302   : > { %v816_v3 = vpack.c.bf16 %v1766_v2, %v1766_v2  ;;  %v813_v20 = vsel %vm760_vm2, %v1766_v2, 0.0  ;;  %v1514_v2 = vld [vmem:[%s2642_s27] ss:$0 sm:$0xff] }
 0x304   : > { %1583 = vmatmul.mubr.msk.bf16.vlgmr.msra.gmra.mxu0 %vm760_vm2, %v816_v3  ;;  %s2532_s20 = scalar_lea.hbm %s2643_s29, %s1519_s25 }
 0x305   : > { %1594 = vmatprep.mubr.msk.bf16.mxu0 %vm2115_vm0, %v2114_v0 }
 0x361   : > { %v920_v4 = vpop.xlane.xlu1 %919 }
 0x362   : > { %v921_v5 = vsub.f32 %v912_v47, %v920_v4 }
 0x364   : > { %v922_v6 = vmul.f32 1.442695, %v921_v5 }
 0x365   : > { %v930_v7 = vpop.permute.xlu1 %929 }
 0x366   : > { %1767 = vpow2.f32 %v922_v6  ;;  %v935_v8 = vsel %vm820_vm3, %v930_v7, 0 }
 0x367   : > { %1593 = vmatpush3.bf16.msra.mxu0 %v935_v8 }
 0x368   : > { %1604 = vmatprep.subr.bf16.mxu0 %v2114_v0 }
 0x369   : > { %v1031_v9 = vpop.xlane.xlu0 %1030  ;;  %v1150_v22 = vpop.permute.xlu1 %1149 }
 0x36a   : > { %v1032_v10 = vsub.f32 %v1023_v52, %v1031_v9  ;;  %v1155_v25 = vsel %vm820_vm3, %v1150_v22, 0 }
 0x36c   : > { %v1033_v11 = vmul.f32 1.442695, %v1032_v10 }
 0x36e   : > { %1769 = vpow2.f32 %v1033_v11 }
 0x371   : > { %v1141_v12 = vpop.xlane.xlu0 %1140 }
 0x372   : > { %v1142_v13 = vsub.f32 %v1133_v57, %v1141_v12 }
 0x373   : > { %v1768_v14 = vpop.eup %1767 }
 0x374   : > { %v1143_v15 = vmul.f32 1.442695, %v1142_v13  ;;  %v924_v16 = vsel %vm760_vm2, %v1768_v14, 0.0  ;;  %v927_v17 = vpack.c.bf16 %v1768_v14, %v1768_v14 }
 0x375   : > { %v1040_v18 = vpop.permute.xlu0 %1039  ;;  %925 = vadd.xlane.f32.xlu1 %v924_v16 }
 0x376   : > { %1771 = vpow2.f32 %v1143_v15  ;;  %v1045_v19 = vsel %vm820_vm3, %v1040_v18, 0  ;;  %1595 = vmatmul.mubr.msk.bf16.vlgmr.msra.gmra.mxu0 %vm760_vm2, %v927_v17 }
 0x377   : > { %1605 = vmatpush3.bf16.msra.mxu0 %v1045_v19  ;;  %1606 = vmatprep.mubr.msk.bf16.mxu0 %vm2115_vm0, %v2114_v0 }
 0x378   : > { %1616 = vmatprep.subr.bf16.mxu0 %v2114_v0 }
 0x379   : > { %814 = vadd.xlane.f32.xlu1 %v813_v20 }
 0x37b   : > { %v1770_v21 = vpop.eup %1769 }
 0x37c   : > { %v1035_v23 = vsel %vm760_vm2, %v1770_v21, 0.0  ;;  %v1038_v24 = vpack.c.bf16 %v1770_v21, %v1770_v21 }
 0x37d   : > { %1036 = vadd.xlane.f32.xlu0 %v1035_v23 }
 0x37e   : > { %1607 = vmatmul.mubr.msk.bf16.vlgmr.msra.gmra.mxu0 %vm760_vm2, %v1038_v24 }
 0x37f   : > { %1617 = vmatpush3.bf16.msra.mxu0 %v1155_v25  ;;  %1618 = vmatprep.mubr.msk.bf16.mxu0 %vm2115_vm0, %v2114_v0 }
 0x383   : > { %v1772_v26 = vpop.eup %1771 }
 0x384   : > { %v1145_v27 = vsel %vm760_vm2, %v1772_v26, 0.0  ;;  %v1148_v28 = vpack.c.bf16 %v1772_v26, %v1772_v26 }
 0x385   : > { %1146 = vadd.xlane.f32.xlu0 %v1145_v27 }
 0x386   : > { %1619 = vmatmul.mubr.msk.bf16.vlgmr.msra.gmra.mxu0 %vm760_vm2, %v1148_v28 }
 0x3c4   : > { %v858_v29 = vpop.f32.mrf.mxu0 }
 0x3c6   : > { %v1584_v30 = vpop.f32.mrf.mxu0 }
 0x3c8   : > { %v861_v31 = vpop.f32.mrf.mxu0 }
 0x3ca   : > { %v1585_v32 = vpop.f32.mrf.mxu0 }
 0x3fe   : > { %v926_v33 = vpop.xlane.xlu1 %925 }
 0x3ff   : > { %1773 = vrcp.f32 %v926_v33 }
 0x402   : > { %v815_v55 = vpop.xlane.xlu1 %814 }
 0x406   : > { %v1037_v34 = vpop.xlane.xlu0 %1036 }
 0x407   : > { %1775 = vrcp.f32 %v1037_v34 }
 0x40c   : > { %v1774_v36 = vpop.eup %1773 }
 0x40e   : > { %v1147_v37 = vpop.xlane.xlu0 %1146 }
 0x40f   : > { %1777 = vrcp.f32 %v1147_v37 }
 0x410   : > { %1779 = vrcp.f32 %v815_v55 }
 0x414   : > { %v1776_v44 = vpop.eup %1775 }
 0x41c   : > { %v1778_v0 = vpop.eup %1777 }
 0x41d   : > { %v1780_v56 = vpop.eup %1779 }
 0x41e   : > { %v865_v59 = vmul.f32 %v1780_v56, %v858_v29 }
 0x436   : > { %v971_v38 = vpop.f32.mrf.mxu0 }
 0x437   : > { %v978_v39 = vmul.f32 %v1774_v36, %v971_v38 }
 0x438   : > { %v1596_v40 = vpop.f32.mrf.mxu0 }
 0x439   : > { %1200 = vrot.lane.b32.xlu0 %v978_v39, %s2119_s11  ;;  %s2027_s11 = scalar_lea.vmem %s2026_s10, 256 }
 0x43a   : > { %v974_v41 = vpop.f32.mrf.mxu0  ;;  %p2029_p5 = scmp.lt.s32.totalorder %s2027_s11, %s2021_s23 }
 0x43c   : > { %v1597_v43 = vpop.f32.mrf.mxu0  ;;  %p2030_p9 = por %p2029_p5, %p2028_p1 }
 0x43e   : > { %v1081_v45 = vpop.f32.mrf.mxu0  ;;  %p2031_p11 = pnand %p2030_p9, %p2024_p3 }
 0x43f   : > { %v1088_v46 = vmul.f32 %v1776_v44, %v1081_v45 }
 0x440   : > { %v1608_v47 = vpop.f32.mrf.mxu0 }
 0x441   : > { %1204 = vrot.lane.b32.xlu1 %v1088_v46, %s2120_s7 }
 0x442   : > { %v1084_v48 = vpop.f32.mrf.mxu0 }
 0x444   : > { %v1609_v49 = vpop.f32.mrf.mxu0 }
 0x446   : > { %v1191_v50 = vpop.f32.mrf.mxu0 }
 0x447   : > { %v1198_v51 = vmul.f32 %v1778_v0, %v1191_v50 }
 0x448   : > { %v1620_v52 = vpop.f32.mrf.mxu0 }
 0x449   : > { %1208 = vrot.lane.b32.xlu1 %v1198_v51, %s2121_s12 }
 0x44a   : > { %v1194_v53 = vpop.f32.mrf.mxu0 }
 0x44c   : > { %v1621_v54 = vpop.f32.mrf.mxu0 }
 0x4ab   : > { %v1201_v57 = vpop.permute.xlu0 %1200 }
 0x4ac   : > { %v1211_v60 = vsel %vm760_vm2, %v865_v59, %v1201_v57 }
 0x4b3   : > { %v1205_v58 = vpop.permute.xlu1 %1204 }
 0x4b4   : > { %v1213_v61 = vsel %vm1212_vm4, %v1211_v60, %v1205_v58 }
 0x4bb   : > { %v1209_v62 = vpop.permute.xlu1 %1208 }
 0x4bc   : > { %v1215_v63 = vsel %vm1214_vm5, %v1213_v61, %v1209_v62 }
 0x4bd   : > { %v1216_v1 = vpack.c.bf16 %v1215_v63, %v1215_v63 }
 0x4bf   : > { %1627 = vmatmul.mubr.msk.bf16.vlgmr.msra.gmra.mxu1 %vm581_vm1, %v1216_v1 }
 0x57f   : > { %v1277_v3 = vpop.f32.mrf.mxu1 }
 0x580   : > { %v1278_v4 = vadd.f32 %v1514_v2, %v1277_v3 }
 0x581   : > { %v1628_v5 = vpop.f32.mrf.mxu1 }
 0x582   : > { %1283 = vst.msk [vmem:[%s553_s24] sm:$0xff] %vm581_vm1, %v1278_v4 }
 0x583   : > { %v1280_v6 = vpop.f32.mrf.mxu1 }
 0x584   : > { %2034 = shalt.err (!%p2031_p11)
}
 0x585   : > { %s2035_s3 = scalar_lea.hbm %s2532_s20, 128  ;;  %s2039_s7 = scalar_lea.hbm %s2643_s29, 256 }
 0x586   : > { %p2036_p13 = scmp.ne.s32.totalorder %s2532_s20, %s2035_s3  ;;  %p2040_p6 = scmp.lt.s32.totalorder %s2532_s20, %s2643_s29 }
 0x587   : > { %p2041_p7 = scmp.lt.s32.totalorder %s2039_s7, %s2035_s3 }
 0x588   : > { %p2037_p2 = pnand %p2036_p13, %p2644_p12 }
 0x589   : > { %p2042_p8 = por %p2041_p7, %p2040_p6 }
 0x58a   : > { %p2038_p0 = pneg %p2037_p2 }
 0x58c   : > { %p2043_p10 = pnand %p2042_p8, %p2038_p0 }
 0x58e   : > { %2046 = shalt.err (!%p2043_p10)
}
 0x58f   : > { %1660 = dma.vmem_to_hbm [thread:$0]  (%p2644_p12), %s2534_s28, 128, %s2532_s20, %s1285_s16   ;;  %v1629_v7 = vpop.f32.mrf.mxu1 }
 0x590 PF: > { %s2645_s13 = sld [smem:[#allocation24_spill]] }
 0x591   : > { %s2646_s14 = sld [smem:[#allocation29_spill]] }
 0x592   : > { %s2647_s27 = sld [smem:[#allocation25_spill]] }
 0x596   : > { %s1310_s25 = sand.u32 1, %s2645_s13  }
 0x597   : > { %p2648_p4 = scmp.ne.s32.totalorder %s2646_s14, 0  ;;  %s1311_s24 = scalar_lea.sflag [#allocation4], %s1310_s25 }
 0x598   : > { %p2649_p3 = scmp.ge.s32.totalorder %s2647_s27, 2 }
 0x59a   : > { %p1692_p1 = pnand %p2649_p3, %p2648_p4 }
 0x59c   : > { %p1693_p5 = pneg %p1692_p1 }
 0x59e   : > { %2084 = dma.done.wait (%p1693_p5), %s1311_s24, 128  }
 0x59f   : > { %2086 = vsyncadd (%p1693_p5), %s1311_s24, 4294967168  ;;  %s2650_s20 = sld [smem:[#allocation26_spill]]  ;;  %s2652_s17 = smov %s2093_s18 }
 0x5a0   : > { %s2651_s15 = sld [smem:[#allocation27_spill]]  ;;  %s2653_s18 = smov %s2097_s19 }
 0x5a5   : > { %p30_p9 = scmp.ge.s32.totalorder %s2650_s20, 4  }
 0x5a6   : > { %s2654_s19 = smov %s2651_s15 }
 0x5a7   :  { %32 = sbr.rel (!%p30_p9) target bundleno = 16 (0x10), region = 157 }
 0x5ac   :  { %1316 = vsyncpa [#allocation3], 1 }
 0x5ad   :  { %1318 = vsyncpa [#allocation3 + $0x1], 1 }
 0x5ae   :  { %1319 = vsyncpa [#allocation6], 1 }
 0x5af   :  { %1321 = vsyncpa [#allocation6 + $0x1], 1 }
 0x5b0   :  { %1322 = vsyncpa [#allocation9], 1 }
 0x5b1   :  { %1323 = vsyncpa [#allocation12], 1 }
 0x5b2   :  { %1324 = vsyncpa [#allocation15], 1 }
 0x5b3   :  { %1325 = vsyncpa [#allocation4], 1 }
 0x5b4   :  { %1327 = vsyncpa [#allocation4 + $0x1], 1 }

</bundles_post_ra>
